<compile_context>
chip_gen: v6e
topology: v6e:2x2x1
jax: 0.10.0
libtpu: 0.0.40
codegen_flags: <defaults>
</compile_context>

<pallas_src>
import functools

import jax
import jax.numpy as jnp
from jax.experimental import pallas as pl
from jax.experimental.pallas import tpu as pltpu

SUBLANE = 8      # f32 sublane width
MAX_TB = 2048    # batch-tile cap (keeps double-buffered tiles ~4 MiB)


def _round_up(x, m):
    return ((x + m - 1) // m) * m


def _lstm_opt_kernel(inp_ref, state_ref,
                     wih1_ref, whh1_ref, b1_ref,
                     wcat2_ref, b2_ref,
                     wout_ref, bout_ref,
                     out_ref, state_out_ref):
    H = wout_ref.shape[1]           # hidden dim (tight, no padding)

    x = inp_ref[...]                # (TB, 1)
    state = state_ref[...]          # (TB, 4H): one dense load
    h1 = state[:, 0 * H:1 * H]
    h2 = state[:, 1 * H:2 * H]
    c1 = state[:, 2 * H:3 * H]
    c2 = state[:, 3 * H:4 * H]

    def gates_to_hc(gates, c):
        i = jax.nn.sigmoid(gates[:, 0 * H:1 * H])
        f = jax.nn.sigmoid(gates[:, 1 * H:2 * H])
        g = jnp.tanh(gates[:, 2 * H:3 * H])
        o = jax.nn.sigmoid(gates[:, 3 * H:4 * H])
        c_new = f * c + i * g
        h_new = o * jnp.tanh(c_new)
        return h_new, c_new

    # --- LSTMCell 1 (input size 1): K=1 matmul -> VPU broadcast multiply.
    gates1 = (x * wih1_ref[...]
              + jnp.dot(h1, whh1_ref[...], preferred_element_type=jnp.float32)
              + b1_ref[...])
    h1n, c1n = gates_to_hc(gates1, c1)

    # --- LSTMCell 2: fused [W_ih; W_hh] -> single MXU matmul with K = 2H.
    # TODO(synk): optionally cast matmul operands to bf16 (keep f32 accum /
    # f32 gate+state math) on v5e/v6e/v7x after validating optimizer quality.
    h12 = jnp.concatenate([h1n, h2], axis=-1)                 # (TB, 2H)
    gates2 = (jnp.dot(h12, wcat2_ref[...], preferred_element_type=jnp.float32)
              + b2_ref[...])
    h2n, c2n = gates_to_hc(gates2, c2)

    # --- Output Linear (H -> 1): VPU multiply + XLU lane reduce, 1-lane store.
    out_ref[...] = (jnp.sum(h2n * wout_ref[...], axis=-1, keepdims=True)
                    + bout_ref[...])

    # --- Packed new state, one dense (TB, 4H) store (no lane padding).
    state_out_ref[...] = jnp.concatenate([h1n, h2n, c1n, c2n], axis=-1)


def _tile_batch(B):
    """Pick (TB, Bp): >=2 grid steps whenever possible, TB capped at MAX_TB."""
    Bp8 = _round_up(max(B, SUBLANE), SUBLANE)
    TB = max(SUBLANE, min(MAX_TB, _round_up(Bp8 // 2, SUBLANE)))
    Bp = _round_up(Bp8, TB)
    return TB, Bp


def prepare_params(params):
    """One-time weight prep, hoisted out of the per-step path."""
    wih1, whh1, b1, wih2, whh2, b2, wout, bout = params
    f32 = jnp.float32
    return (wih1.astype(f32),                                   # (1, 4H)
            whh1.astype(f32),                                   # (H, 4H)
            b1.astype(f32),                                     # (1, 4H)
            jnp.concatenate([wih2, whh2], axis=0).astype(f32),  # (2H, 4H)
            b2.astype(f32),                                     # (1, 4H)
            wout.astype(f32).T,                                 # (1, H)
            bout.astype(f32).reshape(1, 1))                     # (1, 1)


def pack_state(hid0, cell, Bp):
    """One-time packing of (h1,h2,c1,c2) into the persistent (Bp, 4H) slab."""
    B = hid0[0].shape[0]
    slab = jnp.concatenate([hid0[0], hid0[1], cell[0], cell[1]],
                           axis=1).astype(jnp.float32)          # (B, 4H)
    return jnp.pad(slab, ((0, Bp - B), (0, 0)))


def unpack_state(state, B, H):
    return ((state[:B, 0 * H:1 * H], state[:B, 1 * H:2 * H]),
            (state[:B, 2 * H:3 * H], state[:B, 3 * H:4 * H]))


def make_optimizer_step(B, H):
    """Build the jitted step: (inp0 (B,1), packed state (Bp,4H), params) ->
    (output (B,1), new packed state (Bp,4H)).  State is donated + aliased."""
    TB, Bp = _tile_batch(B)
    H4 = 4 * H
    f32 = jnp.float32

    rowi = lambda i: (i, 0)   # batch-tiled arrays
    row0 = lambda i: (0, 0)   # weights: VMEM-resident across the grid
    # NOTE: weights total only ~50 KB untiled here, so single-buffering them
    # (pipeline_mode=pl.Buffered(1)) is skipped; negligible VMEM saving.

    in_specs = [
        pl.BlockSpec((TB, 1), rowi),         # inp
        pl.BlockSpec((TB, H4), rowi),        # packed [h1|h2|c1|c2]
        pl.BlockSpec((1, H4), row0),         # wih1 (single row)
        pl.BlockSpec((H, H4), row0),         # whh1
        pl.BlockSpec((1, H4), row0),         # b1 (= b_ih + b_hh)
        pl.BlockSpec((2 * H, H4), row0),     # [wih2; whh2] stacked
        pl.BlockSpec((1, H4), row0),         # b2
        pl.BlockSpec((1, H), row0),          # wout (row)
        pl.BlockSpec((1, 1), row0),          # bout
    ]
    out_specs = (
        pl.BlockSpec((TB, 1), rowi),         # output, true 1-lane column
        pl.BlockSpec((TB, H4), rowi),        # packed new state
    )
    out_shape = (
        jax.ShapeDtypeStruct((Bp, 1), f32),
        jax.ShapeDtypeStruct((Bp, H4), f32),
    )

    call = pl.pallas_call(
        _lstm_opt_kernel,
        grid=(Bp // TB,),
        in_specs=in_specs,
        out_specs=out_specs,
        out_shape=out_shape,
        input_output_aliases={1: 1},         # state updated in place
        compiler_params=pltpu.CompilerParams(
            dimension_semantics=("parallel",)),
    )

    @functools.partial(jax.jit, donate_argnums=(1,))
    def step(inp0, state, prepped):
        wih1, whh1, b1, wcat2, b2, wout_row, bout = prepped
        inp_p = jnp.pad(inp0.astype(f32), ((0, Bp - B), (0, 0)))
        out_p, state_new = call(inp_p, state, wih1, whh1, b1,
                                wcat2, b2, wout_row, bout)
        return out_p[:B], state_new

    return step, Bp


def init_params(key, hid_dim):
    """Deterministic init mimicking PyTorch LSTMCell/Linear uniform init.

    Weights are stored pre-transposed: (in_features, out_features).
    Biases b_ih + b_hh are fused into a single (1, 4H) bias per LSTM cell.
    """
    H = hid_dim
    k = 1.0 / jnp.sqrt(jnp.float32(H))
    keys = jax.random.split(key, 10)
    u = lambda kk, shape: jax.random.uniform(kk, shape, jnp.float32, -k, k)

    wih1 = u(keys[0], (1, 4 * H))       # LSTMCell1 W_ih^T
    whh1 = u(keys[1], (H, 4 * H))       # LSTMCell1 W_hh^T
    b1 = u(keys[2], (1, 4 * H)) + u(keys[3], (1, 4 * H))   # b_ih + b_hh
    wih2 = u(keys[4], (H, 4 * H))       # LSTMCell2 W_ih^T
    whh2 = u(keys[5], (H, 4 * H))       # LSTMCell2 W_hh^T
    b2 = u(keys[6], (1, 4 * H)) + u(keys[7], (1, 4 * H))
    wout = u(keys[8], (H, 1))           # Linear W^T
    bout = u(keys[9], (1, 1))
    return (wih1, whh1, b1, wih2, whh2, b2, wout, bout)


def _reference_forward(inp0, hid0, cell, params):
    """Pure-JAX reference of the PyTorch semantics for validation."""
    (wih1, whh1, b1, wih2, whh2, b2, wout, bout) = params
    H = hid0[0].shape[1]

    def lstm_cell(x, h, c, wih, whh, b):
        gates = x @ wih + h @ whh + b
        i = jax.nn.sigmoid(gates[:, 0:H])
        f = jax.nn.sigmoid(gates[:, H:2 * H])
        g = jnp.tanh(gates[:, 2 * H:3 * H])
        o = jax.nn.sigmoid(gates[:, 3 * H:4 * H])
        c_new = f * c + i * g
        return o * jnp.tanh(c_new), c_new

    h1, c1 = lstm_cell(inp0, hid0[0], cell[0], wih1, whh1, b1)
    h2, c2 = lstm_cell(h1, hid0[1], cell[1], wih2, whh2, b2)
    return h2 @ wout + bout, (h1, h2), (c1, c2)


if __name__ == "__main__":
    B = 8          # batch of scalar "gradient" inputs
    HID = 32       # hid_dim (constructor arg; module default is 20)

    key = jax.random.PRNGKey(0)
    kp, k1, k2, k3, k4, k5 = jax.random.split(key, 6)

    params = init_params(kp, HID)

    inp0 = jax.random.normal(k1, (B, 1), jnp.float32)
    hid0 = (jax.random.normal(k2, (B, HID), jnp.float32),
            jax.random.normal(k3, (B, HID), jnp.float32))
    cell = (jax.random.normal(k4, (B, HID), jnp.float32),
            jax.random.normal(k5, (B, HID), jnp.float32))

    # one-time prep: padded/fused weights + persistent packed state slab
    step, Bp = make_optimizer_step(B, HID)
    prepped = prepare_params(params)
    state = pack_state(hid0, cell, Bp)

    out, state = step(inp0, state, prepped)   # state donated & updated in place
    jax.block_until_ready((out, state))

    (h1, h2), (c1, c2) = unpack_state(state, B, HID)

    # sanity check against pure-JAX reference
    ref_out, (rh1, rh2), (rc1, rc2) = _reference_forward(inp0, hid0, cell, params)
    for a, b_ in ((out, ref_out), (h1, rh1), (h2, rh2), (c1, rc1), (c2, rc2)):
        assert jnp.allclose(a, b_, atol=1e-5, rtol=1e-4), "mismatch vs reference"

    print("KERNEL_OK")
</pallas_src>

<mosaic_0001>
module attributes {stable_mosaic.version = 11 : i64} {
  func.func @_lstm_opt_kernel(%arg0: i32, %arg1: memref<8x1xf32, #tpu.memory_space<vmem>>, %arg2: memref<8x128xf32, #tpu.memory_space<vmem>>, %arg3: memref<1x128xf32, #tpu.memory_space<vmem>>, %arg4: memref<32x128xf32, #tpu.memory_space<vmem>>, %arg5: memref<1x128xf32, #tpu.memory_space<vmem>>, %arg6: memref<64x128xf32, #tpu.memory_space<vmem>>, %arg7: memref<1x128xf32, #tpu.memory_space<vmem>>, %arg8: memref<1x32xf32, #tpu.memory_space<vmem>>, %arg9: memref<1x1xf32, #tpu.memory_space<vmem>>, %arg10: memref<8x1xf32, #tpu.memory_space<vmem>>, %arg11: memref<8x128xf32, #tpu.memory_space<vmem>>) attributes {dimension_semantics = [#tpu.dimension_semantics<parallel>], iteration_bounds = array<i64: 1>, scalar_prefetch = 0 : i64, scratch_operands = 0 : i64, tpu.core_type = #tpu.core_type<tc>, window_params = [{transform_indices = @transform_0, window_bounds = array<i64: 8, 1>}, {transform_indices = @transform_1, window_bounds = array<i64: 8, 128>}, {pipeline_mode = #tpu.pipeline_mode<synchronous>, transform_indices = @transform_2, window_bounds = array<i64: 1, 128>}, {pipeline_mode = #tpu.pipeline_mode<synchronous>, transform_indices = @transform_3, window_bounds = array<i64: 32, 128>}, {pipeline_mode = #tpu.pipeline_mode<synchronous>, transform_indices = @transform_4, window_bounds = array<i64: 1, 128>}, {pipeline_mode = #tpu.pipeline_mode<synchronous>, transform_indices = @transform_5, window_bounds = array<i64: 64, 128>}, {pipeline_mode = #tpu.pipeline_mode<synchronous>, transform_indices = @transform_6, window_bounds = array<i64: 1, 128>}, {pipeline_mode = #tpu.pipeline_mode<synchronous>, transform_indices = @transform_7, window_bounds = array<i64: 1, 32>}, {pipeline_mode = #tpu.pipeline_mode<synchronous>, transform_indices = @transform_8, window_bounds = array<i64: 1, 1>}, {transform_indices = @transform_9, window_bounds = array<i64: 8, 1>}, {transform_indices = @transform_10, window_bounds = array<i64: 8, 128>}]} {
    %c0 = arith.constant 0 : index
    %c0_0 = arith.constant 0 : index
    %0 = vector.load %arg1[%c0, %c0_0] : memref<8x1xf32, #tpu.memory_space<vmem>>, vector<8x1xf32>
    %c0_1 = arith.constant 0 : index
    %c0_2 = arith.constant 0 : index
    %1 = vector.load %arg2[%c0_1, %c0_2] : memref<8x128xf32, #tpu.memory_space<vmem>>, vector<8x128xf32>
    %2 = vector.extract_strided_slice %1 {offsets = [0, 0], sizes = [8, 32], strides = [1, 1]} : vector<8x128xf32> to vector<8x32xf32>
    %3 = vector.extract_strided_slice %1 {offsets = [0, 32], sizes = [8, 32], strides = [1, 1]} : vector<8x128xf32> to vector<8x32xf32>
    %4 = vector.extract_strided_slice %1 {offsets = [0, 64], sizes = [8, 32], strides = [1, 1]} : vector<8x128xf32> to vector<8x32xf32>
    %5 = vector.extract_strided_slice %1 {offsets = [0, 96], sizes = [8, 32], strides = [1, 1]} : vector<8x128xf32> to vector<8x32xf32>
    %c0_3 = arith.constant 0 : index
    %c0_4 = arith.constant 0 : index
    %6 = vector.load %arg3[%c0_3, %c0_4] : memref<1x128xf32, #tpu.memory_space<vmem>>, vector<1x128xf32>
    %7 = vector.broadcast %0 : vector<8x1xf32> to vector<8x128xf32>
    %8 = vector.broadcast %6 : vector<1x128xf32> to vector<8x128xf32>
    %9 = arith.mulf %7, %8 : vector<8x128xf32>
    %c0_5 = arith.constant 0 : index
    %c0_6 = arith.constant 0 : index
    %10 = vector.load %arg4[%c0_5, %c0_6] : memref<32x128xf32, #tpu.memory_space<vmem>>, vector<32x128xf32>
    %cst = arith.constant dense<0.000000e+00> : vector<8x128xf32>
    %11 = tpu.matmul %2, %10, %cst {dimension_numbers = #tpu.dot_dimension_numbers<[1], [0], [0], [1], [0, 0, 1, 1], [], []>} : vector<8x32xf32>, vector<32x128xf32>, vector<8x128xf32> -> vector<8x128xf32>
    %12 = arith.addf %9, %11 : vector<8x128xf32>
    %c0_7 = arith.constant 0 : index
    %c0_8 = arith.constant 0 : index
    %13 = vector.load %arg5[%c0_7, %c0_8] : memref<1x128xf32, #tpu.memory_space<vmem>>, vector<1x128xf32>
    %14 = vector.broadcast %13 : vector<1x128xf32> to vector<8x128xf32>
    %15 = arith.addf %12, %14 : vector<8x128xf32>
    %16 = vector.extract_strided_slice %15 {offsets = [0, 0], sizes = [8, 32], strides = [1, 1]} : vector<8x128xf32> to vector<8x32xf32>
    %17 = arith.negf %16 : vector<8x32xf32>
    %18 = math.exp %17 : vector<8x32xf32>
    %cst_9 = arith.constant 1.000000e+00 : f32
    %19 = vector.broadcast %cst_9 : f32 to vector<8x32xf32>
    %20 = arith.addf %19, %18 : vector<8x32xf32>
    %21 = arith.divf %19, %20 : vector<8x32xf32>
    %22 = vector.extract_strided_slice %15 {offsets = [0, 32], sizes = [8, 32], strides = [1, 1]} : vector<8x128xf32> to vector<8x32xf32>
    %23 = arith.negf %22 : vector<8x32xf32>
    %24 = math.exp %23 : vector<8x32xf32>
    %cst_10 = arith.constant 1.000000e+00 : f32
    %25 = vector.broadcast %cst_10 : f32 to vector<8x32xf32>
    %26 = arith.addf %25, %24 : vector<8x32xf32>
    %27 = arith.divf %25, %26 : vector<8x32xf32>
    %28 = vector.extract_strided_slice %15 {offsets = [0, 64], sizes = [8, 32], strides = [1, 1]} : vector<8x128xf32> to vector<8x32xf32>
    %29 = math.tanh %28 : vector<8x32xf32>
    %30 = vector.extract_strided_slice %15 {offsets = [0, 96], sizes = [8, 32], strides = [1, 1]} : vector<8x128xf32> to vector<8x32xf32>
    %31 = arith.negf %30 : vector<8x32xf32>
    %32 = math.exp %31 : vector<8x32xf32>
    %cst_11 = arith.constant 1.000000e+00 : f32
    %33 = vector.broadcast %cst_11 : f32 to vector<8x32xf32>
    %34 = arith.addf %33, %32 : vector<8x32xf32>
    %35 = arith.divf %33, %34 : vector<8x32xf32>
    %36 = arith.mulf %27, %4 : vector<8x32xf32>
    %37 = arith.mulf %21, %29 : vector<8x32xf32>
    %38 = arith.addf %36, %37 : vector<8x32xf32>
    %39 = math.tanh %38 : vector<8x32xf32>
    %40 = arith.mulf %35, %39 : vector<8x32xf32>
    %41 = tpu.concatenate %40, %3 in 1 : vector<8x32xf32>, vector<8x32xf32> -> vector<8x64xf32>
    %c0_12 = arith.constant 0 : index
    %c0_13 = arith.constant 0 : index
    %42 = vector.load %arg6[%c0_12, %c0_13] : memref<64x128xf32, #tpu.memory_space<vmem>>, vector<64x128xf32>
    %cst_14 = arith.constant dense<0.000000e+00> : vector<8x128xf32>
    %43 = tpu.matmul %41, %42, %cst_14 {dimension_numbers = #tpu.dot_dimension_numbers<[1], [0], [0], [1], [0, 0, 1, 1], [], []>} : vector<8x64xf32>, vector<64x128xf32>, vector<8x128xf32> -> vector<8x128xf32>
    %c0_15 = arith.constant 0 : index
    %c0_16 = arith.constant 0 : index
    %44 = vector.load %arg7[%c0_15, %c0_16] : memref<1x128xf32, #tpu.memory_space<vmem>>, vector<1x128xf32>
    %45 = vector.broadcast %44 : vector<1x128xf32> to vector<8x128xf32>
    %46 = arith.addf %43, %45 : vector<8x128xf32>
    %47 = vector.extract_strided_slice %46 {offsets = [0, 0], sizes = [8, 32], strides = [1, 1]} : vector<8x128xf32> to vector<8x32xf32>
    %48 = arith.negf %47 : vector<8x32xf32>
    %49 = math.exp %48 : vector<8x32xf32>
    %cst_17 = arith.constant 1.000000e+00 : f32
    %50 = vector.broadcast %cst_17 : f32 to vector<8x32xf32>
    %51 = arith.addf %50, %49 : vector<8x32xf32>
    %52 = arith.divf %50, %51 : vector<8x32xf32>
    %53 = vector.extract_strided_slice %46 {offsets = [0, 32], sizes = [8, 32], strides = [1, 1]} : vector<8x128xf32> to vector<8x32xf32>
    %54 = arith.negf %53 : vector<8x32xf32>
    %55 = math.exp %54 : vector<8x32xf32>
    %cst_18 = arith.constant 1.000000e+00 : f32
    %56 = vector.broadcast %cst_18 : f32 to vector<8x32xf32>
    %57 = arith.addf %56, %55 : vector<8x32xf32>
    %58 = arith.divf %56, %57 : vector<8x32xf32>
    %59 = vector.extract_strided_slice %46 {offsets = [0, 64], sizes = [8, 32], strides = [1, 1]} : vector<8x128xf32> to vector<8x32xf32>
    %60 = math.tanh %59 : vector<8x32xf32>
    %61 = vector.extract_strided_slice %46 {offsets = [0, 96], sizes = [8, 32], strides = [1, 1]} : vector<8x128xf32> to vector<8x32xf32>
    %62 = arith.negf %61 : vector<8x32xf32>
    %63 = math.exp %62 : vector<8x32xf32>
    %cst_19 = arith.constant 1.000000e+00 : f32
    %64 = vector.broadcast %cst_19 : f32 to vector<8x32xf32>
    %65 = arith.addf %64, %63 : vector<8x32xf32>
    %66 = arith.divf %64, %65 : vector<8x32xf32>
    %67 = arith.mulf %58, %5 : vector<8x32xf32>
    %68 = arith.mulf %52, %60 : vector<8x32xf32>
    %69 = arith.addf %67, %68 : vector<8x32xf32>
    %70 = math.tanh %69 : vector<8x32xf32>
    %71 = arith.mulf %66, %70 : vector<8x32xf32>
    %c0_20 = arith.constant 0 : index
    %c0_21 = arith.constant 0 : index
    %72 = vector.load %arg8[%c0_20, %c0_21] : memref<1x32xf32, #tpu.memory_space<vmem>>, vector<1x32xf32>
    %73 = vector.broadcast %72 : vector<1x32xf32> to vector<8x32xf32>
    %74 = arith.mulf %71, %73 : vector<8x32xf32>
    %cst_22 = arith.constant dense<0.000000e+00> : vector<8xf32>
    %75 = vector.multi_reduction <add>, %74, %cst_22 [1] : vector<8x32xf32> to vector<8xf32>
    %76 = vector.shape_cast %75 : vector<8xf32> to vector<8x1xf32>
    %c0_23 = arith.constant 0 : index
    %c0_24 = arith.constant 0 : index
    %77 = vector.load %arg9[%c0_23, %c0_24] : memref<1x1xf32, #tpu.memory_space<vmem>>, vector<1x1xf32>
    %78 = vector.broadcast %77 : vector<1x1xf32> to vector<8x1xf32>
    %79 = arith.addf %76, %78 : vector<8x1xf32>
    %c0_25 = arith.constant 0 : index
    %c0_26 = arith.constant 0 : index
    %80 = vector.load %arg10[%c0_25, %c0_26] : memref<8x1xf32, #tpu.memory_space<vmem>>, vector<8x1xf32>
    tpu.vector_store %arg10[%c0_25, %c0_26], %79 {strides = array<i32>} : memref<8x1xf32, #tpu.memory_space<vmem>>, vector<8x1xf32>,
    %81 = tpu.concatenate %40, %71, %38, %69 in 1 : vector<8x32xf32>, vector<8x32xf32>, vector<8x32xf32>, vector<8x32xf32> -> vector<8x128xf32>
    %c0_27 = arith.constant 0 : index
    %c0_28 = arith.constant 0 : index
    %82 = vector.load %arg11[%c0_27, %c0_28] : memref<8x128xf32, #tpu.memory_space<vmem>>, vector<8x128xf32>
    tpu.vector_store %arg11[%c0_27, %c0_28], %81 {strides = array<i32>} : memref<8x128xf32, #tpu.memory_space<vmem>>, vector<8x128xf32>,
    return
  }
  func.func @transform_0(%arg0: i32) -> (i32, i32) {
    %c0_i32 = arith.constant 0 : i32
    %c0_i32_0 = arith.constant 0 : i32
    return %arg0, %c0_i32 : i32, i32
  }
  func.func @transform_1(%arg0: i32) -> (i32, i32) {
    %c0_i32 = arith.constant 0 : i32
    %c0_i32_0 = arith.constant 0 : i32
    return %arg0, %c0_i32 : i32, i32
  }
  func.func @transform_2(%arg0: i32) -> (i32, i32) {
    %c0_i32 = arith.constant 0 : i32
    %c0_i32_0 = arith.constant 0 : i32
    %c0_i32_1 = arith.constant 0 : i32
    return %c0_i32, %c0_i32_0 : i32, i32
  }
  func.func @transform_3(%arg0: i32) -> (i32, i32) {
    %c0_i32 = arith.constant 0 : i32
    %c0_i32_0 = arith.constant 0 : i32
    %c0_i32_1 = arith.constant 0 : i32
    return %c0_i32, %c0_i32_0 : i32, i32
  }
  func.func @transform_4(%arg0: i32) -> (i32, i32) {
    %c0_i32 = arith.constant 0 : i32
    %c0_i32_0 = arith.constant 0 : i32
    %c0_i32_1 = arith.constant 0 : i32
    return %c0_i32, %c0_i32_0 : i32, i32
  }
  func.func @transform_5(%arg0: i32) -> (i32, i32) {
    %c0_i32 = arith.constant 0 : i32
    %c0_i32_0 = arith.constant 0 : i32
    %c0_i32_1 = arith.constant 0 : i32
    return %c0_i32, %c0_i32_0 : i32, i32
  }
  func.func @transform_6(%arg0: i32) -> (i32, i32) {
    %c0_i32 = arith.constant 0 : i32
    %c0_i32_0 = arith.constant 0 : i32
    %c0_i32_1 = arith.constant 0 : i32
    return %c0_i32, %c0_i32_0 : i32, i32
  }
  func.func @transform_7(%arg0: i32) -> (i32, i32) {
    %c0_i32 = arith.constant 0 : i32
    %c0_i32_0 = arith.constant 0 : i32
    %c0_i32_1 = arith.constant 0 : i32
    return %c0_i32, %c0_i32_0 : i32, i32
  }
  func.func @transform_8(%arg0: i32) -> (i32, i32) {
    %c0_i32 = arith.constant 0 : i32
    %c0_i32_0 = arith.constant 0 : i32
    %c0_i32_1 = arith.constant 0 : i32
    return %c0_i32, %c0_i32_0 : i32, i32
  }
  func.func @transform_9(%arg0: i32) -> (i32, i32) {
    %c0_i32 = arith.constant 0 : i32
    %c0_i32_0 = arith.constant 0 : i32
    return %arg0, %c0_i32 : i32, i32
  }
  func.func @transform_10(%arg0: i32) -> (i32, i32) {
    %c0_i32 = arith.constant 0 : i32
    %c0_i32_0 = arith.constant 0 : i32
    return %arg0, %c0_i32 : i32, i32
  }
}

</mosaic_0001>

<bundles_post_ra>
// kernel: step.1
= control target key start
LH: loop header
LB: loop body
LE: loop exit
PB: predicated region body
PF: predicated region fallthrough
CT: control target
= control target key end

     0   :  { %s634_s0 = inlined_call_operand.vmem [shape: f32[8,1], index: 0, kind: input, shape index: {}]   ;;  %s635_s1 = inlined_call_operand.vmem [shape: f32[8,128], index: 1, kind: input, shape index: {}, may-alias: {1,10}]   ;;  %s636_s2 = inlined_call_operand.vmem [shape: f32[1,128], index: 2, kind: input, shape index: {}]   ;;  %s637_s3 = inlined_call_operand.hbm [shape: f32[32,128], index: 3, kind: input, shape index: {}]   ;;  %s638_s4 = inlined_call_operand.vmem [shape: f32[1,128], index: 4, kind: input, shape index: {}]   ;;  %s639_s5 = inlined_call_operand.hbm [shape: f32[64,128], index: 5, kind: input, shape index: {}]   ;;  %s640_s6 = inlined_call_operand.vmem [shape: f32[1,128], index: 6, kind: input, shape index: {}]   ;;  %s641_s7 = inlined_call_operand.vmem [shape: f32[1,32], index: 7, kind: input, shape index: {}]   ;;  %s642_s8 = inlined_call_operand.<no memory space> [shape: f32[1,1], index: 8, kind: input, shape index: {}]   ;;  %s643_s9 = inlined_call_operand.vmem [shape: f32[8,1], index: 9, kind: output, shape index: {0}]   ;;  %s644_s10 = inlined_call_operand.vmem [shape: f32[8,128], index: 10, kind: output, shape index: {1}, may-alias: {1,10}]  }
   0x1   :  { %v16_v0 = vstv %s642_s8 }
   0x2   :  { %17 = vst [vmem:[#allocation2] sm:$0x1] %v16_v0 }
   0x3   :  { %18 = vsyncpa [#allocation4], 0 }
   0x4   :  { %19 = vsyncpa [#allocation6], 0  ;;  %s492_s15 = smov [#allocation3]  }
   0x5   :  { %s31_s16 = sshll.u32 %s492_s15, 4  ;;  %s32_s16 = int_to_ptr.vmem [resolvable:$true] %s31_s16 }
   0x6   :  { %s456_s17 = scalar_lea.vmem %s32_s16, 512  ;;  %p461_p1 = scmp.lt.s32.totalorder %s32_s16, %s32_s16 }
   0x7   :  { %p457_p0 = scmp.ne.s32.totalorder %s32_s16, %s456_s17  ;;  %p462_p2 = scmp.lt.s32.totalorder %s456_s17, %s456_s17 }
   0x9   :  { %p463_p3 = por %p462_p2, %p461_p1 }
   0xb   :  { %p464_p4 = pnand %p463_p3, %p457_p0 }
   0xd   :  { %467 = shalt.err (!%p464_p4)
}
   0xe   :  { %s493_s18 = smov 128   ;;  %s494_s19 = smov 8  }
   0xf   :  { %37 = dma.hbm_to_vmem [thread:$0]  %s637_s3, 512, %s32_s16, [#allocation4], %s493_s18, %s493_s18, %s494_s19  }
  0x10   :  { %s495_s8 = smov [#allocation5]  }
  0x11   :  { %s45_s22 = sshll.u32 %s495_s8, 4  ;;  %s46_s22 = int_to_ptr.vmem [resolvable:$true] %s45_s22 }
  0x12   :  { %s476_s23 = scalar_lea.vmem %s46_s22, 1024  ;;  %p481_p6 = scmp.lt.s32.totalorder %s46_s22, %s46_s22 }
  0x13   :  { %p477_p5 = scmp.ne.s32.totalorder %s46_s22, %s476_s23  ;;  %p482_p7 = scmp.lt.s32.totalorder %s476_s23, %s476_s23 }
  0x15   :  { %p483_p8 = por %p482_p7, %p481_p6 }
  0x17   :  { %p484_p9 = pnand %p483_p8, %p477_p5 }
  0x19   :  { %487 = shalt.err (!%p484_p9)
}
  0x1a   :  { %51 = dma.hbm_to_vmem [thread:$0]  %s639_s5, 1024, %s46_s22, [#allocation6], %s493_s18, %s493_s18, %s494_s19  }
  0x1b   :  { %488 = dma.done.wait [#allocation4], 512  }
  0x1c   :  { %489 = vsyncadd [#allocation4], 4294966784 }
  0x1d   :  { %490 = dma.done.wait [#allocation6], 1024  }
  0x1e   :  { %491 = vsyncadd [#allocation6], 4294966272  ;;  %v496_v1 = vmov 0.0   ;;  %vm497_vm0 = vmmov 0   ;;  %v498_v2 = vmov 0   ;;  %v82_v3 = vld [vmem:[#allocation3 + $0x18] sm:$0xff] }
  0x1f   :  { %391 = vmatprep.subr.mxu0 %v496_v1  ;;  %399 = vmatprep.mubr.msk.f32.mxu0 %vm497_vm0, %v496_v1  ;;  %v81_v4 = vld [vmem:[#allocation3 + $0x10] sm:$0xff]  ;;  %v64_v5 = vld [vmem:[%s634_s0] sm:$0xff]  ;;  %v80_v6 = vld [vmem:[#allocation3 + $0x8] sm:$0xff]  ;;  %s499_s28 = smov 96   ;;  %vm83_vm1 = vcmask 261120   ;;  %s500_s11 = smov 64  }
  0x20   :  { %431 = vset.pattern.permute.xlu0 %v498_v2  ;;  %402 = vmatprep.subr.mxu1 %v496_v1  ;;  %v577_v7 = vld [vmem:[%s635_s1] sm:$0xff]  ;;  %v204_v29 = vld [vmem:[#allocation5 + $0x30] sm:$0xff]  ;;  %v203_v30 = vld [vmem:[#allocation5 + $0x28] sm:$0xff]  ;;  %vm213_vm2 = vcmask 523264   ;;  %vm355_vm3 = vcmask 785408   ;;  %vm339_vm4 = vcmask 7168  }
  0x21   :  { %418 = vmatprep.mubr.msk.f32.mxu1 %vm497_vm0, %v496_v1  ;;  %392 = vmatpush3.msra.mxu0 %v82_v3  ;;  %v79_v8 = vld [vmem:[#allocation3] sm:$0xff]  ;;  %v368_v9 = vld [vmem:[%s636_s2] ss:$0 sm:$0xff]  ;;  %s501_s2 = smov 32   ;;  %v200_v33 = vld [vmem:[#allocation5 + $0x10] sm:$0xff] }
  0x22   :  { %393 = vmatprep.subr.mxu0 %v496_v1  ;;  %69 = vperm.xlu0 %431, %v64_v5   ;;  %v370_v13 = vld [vmem:[%s638_s4] ss:$0 sm:$0xff]  ;;  %v202_v31 = vld [vmem:[#allocation5 + $0x20] sm:$0xff]  ;;  %v199_v35 = vld [vmem:[#allocation5 + $0x8] sm:$0xff] }
  0x23   :  { %394 = vmatpush3.msra.mxu0 %v81_v4  ;;  %173 = vrot.lane.b32.xlu1 %v577_v7, %s499_s28  ;;  %v205_v28 = vld [vmem:[#allocation5 + $0x38] sm:$0xff]  ;;  %v198_v36 = vld [vmem:[#allocation5] sm:$0xff] }
  0x24   :  { %395 = vmatprep.subr.mxu0 %v496_v1  ;;  %403 = vmatpush3.msra.mxu1 %v205_v28  ;;  %v201_v32 = vld [vmem:[#allocation5 + $0x18] sm:$0xff] }
  0x25   :  { %396 = vmatpush3.msra.mxu0 %v80_v6  ;;  %404 = vmatprep.subr.mxu1 %v496_v1  ;;  %v372_v41 = vld [vmem:[%s640_s6] ss:$0 sm:$0xff] }
  0x26   :  { %397 = vmatprep.subr.mxu0 %v496_v1  ;;  %405 = vmatpush3.msra.mxu1 %v204_v29  ;;  %v375_v52 = vld [vmem:[%s641_s7] ss:$0 sm:$0xff] }
  0x27   :  { %398 = vmatpush3.msra.mxu0 %v79_v8  ;;  %406 = vmatprep.subr.mxu1 %v496_v1  ;;  %v376_v6 = vld [vmem:[#allocation2] ss:$0 sm:$0xff] }
  0x28   :  { %400 = vmatmul.mubr.msk.f32.vlgmr.msra.gmra.mxu0 %vm83_vm1, %v577_v7  ;;  %407 = vmatpush3.msra.mxu1 %v203_v30 }
  0x29   :  { %408 = vmatprep.subr.mxu1 %v496_v1 }
  0x2a   :  { %409 = vmatpush3.msra.mxu1 %v202_v31 }
  0x2b   :  { %410 = vmatprep.subr.mxu1 %v496_v1 }
  0x2c   :  { %411 = vmatpush3.msra.mxu1 %v201_v32 }
  0x2d   :  { %412 = vmatprep.subr.mxu1 %v496_v1 }
  0x2e   :  { %413 = vmatpush3.msra.mxu1 %v200_v33 }
  0x2f   :  { %414 = vmatprep.subr.mxu1 %v496_v1 }
  0x30   :  { %415 = vmatpush3.msra.mxu1 %v199_v35 }
  0x31   :  { %416 = vmatprep.subr.mxu1 %v496_v1 }
  0x32   :  { %417 = vmatpush3.msra.mxu1 %v198_v36 }
  0x95   :  { %v174_v24 = vpop.permute.xlu1 %173 }
  0x9d   :  { %v70_v10 = vpop.permute.xlu0 %69 }
  0x9e   :  { %v78_v11 = vmul.f32 %v368_v9, %v70_v10 }
  0xe8   :  { %v153_v12 = vpop.f32.mrf.mxu0 }
  0xe9   :  { %v157_v14 = vadd.f32 %v153_v12, %v78_v11 }
  0xea   :  { %v401_v15 = vpop.f32.mrf.mxu0 }
  0xeb   :  { %v165_v16 = vadd.f32 %v370_v13, %v157_v14 }
  0xed   :  { %432 = vtanh.f32 %v165_v16  ;;  %v371_v18 = vmul.f32 -1.442695, %v165_v16 }
  0xef   :  { %434 = vpow2.f32 %v371_v18 }
  0xfa   :  { %v433_v17 = vpop.eup %432 }
  0xfb   :  { %178 = vrot.lane.b32.xlu0 %v433_v17, %s500_s11 }
  0xfc   :  { %v435_v19 = vpop.eup %434 }
  0xfd   :  { %v169_v20 = vadd.f32 1.0, %v435_v19 }
  0xff   :  { %436 = vrcp.f32 %v169_v20 }
 0x10c   :  { %v437_v21 = vpop.eup %436 }
 0x10d   :  { %v176_v25 = vmul.f32 %v437_v21, %v174_v24 }
 0x16d   :  { %v179_v22 = vpop.permute.xlu0 %178 }
 0x16e   :  { %v181_v23 = vmul.f32 %v437_v21, %v179_v22 }
 0x170   :  { %183 = vrot.lane.b32.xlu1 %v181_v23, %s501_s2 }
 0x1e2   :  { %v184_v26 = vpop.permute.xlu1 %183 }
 0x1e3   :  { %v593_v27 = vadd.f32 %v184_v26, %v176_v25 }
 0x1e5   :  { %438 = vtanh.f32 %v593_v27 }
 0x1f2   :  { %v439_v34 = vpop.eup %438 }
 0x1f3   :  { %189 = vrot.lane.b32.xlu0 %v439_v34, %s500_s11 }
 0x265   :  { %v190_v37 = vpop.permute.xlu0 %189 }
 0x266   :  { %v192_v38 = vmul.f32 %v437_v21, %v190_v37 }
 0x268   :  { %194 = vrot.lane.b32.xlu1 %v192_v38, %s501_s2 }
 0x26c   :  { %294 = vrot.lane.b32.xlu1 %v577_v7, %s500_s11 }
 0x2da   :  { %v195_v39 = vpop.permute.xlu1 %194 }
 0x2db   :  { %v197_v40 = vsel %vm83_vm1, %v195_v39, %v577_v7 }
 0x2dc   :  { %419 = vmatmul.mubr.msk.f32.vlgmr.msra.gmra.mxu1 %vm213_vm2, %v197_v40 }
 0x2de   :  { %v295_v53 = vpop.permute.xlu1 %294 }
 0x39c   :  { %v283_v42 = vpop.f32.mrf.mxu1 }
 0x39d   :  { %v284_v43 = vadd.f32 %v372_v41, %v283_v42 }
 0x39e   :  { %v420_v44 = vpop.f32.mrf.mxu1 }
 0x39f   :  { %440 = vtanh.f32 %v284_v43  ;;  %v374_v46 = vmul.f32 -1.442695, %v284_v43 }
 0x3a1   :  { %442 = vpow2.f32 %v374_v46 }
 0x3ac   :  { %v441_v45 = vpop.eup %440 }
 0x3ad   :  { %299 = vrot.lane.b32.xlu0 %v441_v45, %s500_s11 }
 0x3ae   :  { %v443_v47 = vpop.eup %442 }
 0x3af   :  { %v290_v48 = vadd.f32 1.0, %v443_v47 }
 0x3b1   :  { %444 = vrcp.f32 %v290_v48 }
 0x3be   :  { %v445_v49 = vpop.eup %444 }
 0x3bf   :  { %v297_v54 = vmul.f32 %v445_v49, %v295_v53 }
 0x41f   :  { %v300_v50 = vpop.permute.xlu0 %299 }
 0x420   :  { %v302_v51 = vmul.f32 %v445_v49, %v300_v50 }
 0x422   :  { %304 = vrot.lane.b32.xlu0 %v302_v51, %s501_s2 }
 0x426   :  { %320 = vrot.lane.b32.xlu0 %v375_v52, %s499_s28 }
 0x494   :  { %v305_v55 = vpop.permute.xlu0 %304 }
 0x495   :  { %v307_v56 = vadd.f32 %v305_v55, %v297_v54 }
 0x497   :  { %446 = vtanh.f32 %v307_v56 }
 0x498   :  { %v321_v59 = vpop.permute.xlu0 %320 }
 0x4a4   :  { %v447_v57 = vpop.eup %446 }
 0x4a5   :  { %310 = vrot.lane.b32.xlu1 %v447_v57, %s500_s11 }
 0x517   :  { %v311_v58 = vpop.permute.xlu1 %310 }
 0x518   :  { %v313_v60 = vmul.f32 %v445_v49, %v311_v58 }
 0x51a   :  { %v323_v61 = vmul.f32 %v321_v59, %v313_v60 }
 0x51c   :  { %325 = vrot.lane.b32.xlu1 %v323_v61, %s501_s2 }
 0x520   :  { %342 = vrot.lane.b32.xlu1 %v313_v60, %s500_s11 }
 0x524   :  { %346 = vrot.lane.b32.xlu1 %v593_v27, %s501_s2 }
 0x528   :  { %350 = vrot.lane.b32.xlu1 %v307_v56, %s500_s11 }
 0x58e   :  { %v326_v62 = vpop.permute.xlu1 %325 }
 0x58f   :  { %v328_v63 = vsel %vm83_vm1, %v326_v62, 0.0 }
 0x590   :  { %329 = vadd.xlane.f32.xlu0 %v328_v63 }
 0x592   :  { %v343_v0 = vpop.permute.xlu1 %342 }
 0x593   :  { %v353_v2 = vsel %vm83_vm1, %v195_v39, %v343_v0 }
 0x596   :  { %v347_v1 = vpop.permute.xlu1 %346 }
 0x597   :  { %v354_v3 = vsel %vm213_vm2, %v353_v2, %v347_v1 }
 0x59a   :  { %v351_v4 = vpop.permute.xlu1 %350 }
 0x59b   :  { %v356_v5 = vsel %vm355_vm3, %v354_v3, %v351_v4 }
 0x59c   :  { %357 = vst [vmem:[%s644_s10] sm:$0xff] %v356_v5 }
 0x619   :  { %v330_v7 = vpop.xlane.xlu0 %329 }
 0x61a   :  { %v338_v8 = vadd.f32 %v376_v6, %v330_v7 }
 0x61c   :  { %340 = vst.msk [vmem:[%s643_s9] sm:$0xff] %vm339_vm4, %v338_v8 }
 0x61d   :  { %366 = vsyncpa [#allocation4], 1 }
 0x61e   :  { %367 = vsyncpa [#allocation6], 1 }

</bundles_post_ra>
